<compile_context>
chip_gen: v6e
topology: v6e:2x2x1
jax: 0.10.0
libtpu: 0.0.40
codegen_flags: <defaults>
</compile_context>

<pallas_src>
from functools import partial

import jax
import jax.numpy as jnp
from jax.experimental import pallas as pl
from jax.experimental.pallas import tpu as pltpu


def _ptmodule_kernel(x_ref, o_ref):
    # Keep the reference op order exactly: ((x + 1) * 2) / 3.
    # Python float literals are weakly typed, so math stays in x's dtype.
    y = ((x_ref[...] + 1.0) * 2.0) / 3.0
    o_ref[...] = jnp.where(y > 0.0, y - 5.0, y)


def _row_tile(rows, cols, itemsize, sub, target_bytes):
    """Largest row tile that (a) is a multiple of the packed-sublane count,
    (b) divides `rows`, and (c) keeps one tile <= target_bytes."""
    budget = max(sub, (target_bytes // (cols * itemsize)) // sub * sub)
    if rows <= budget:
        return rows
    t = budget
    while rows % t != 0:  # terminates: rows is a multiple of sub by construction
        t -= sub
    return t


def _plan(n, itemsize, target_bytes=8 << 20):
    """Pick a lane-dense (rows, cols) view of the flat array plus a row tile.

    Returns (rows, cols, tr, pad_elems).  pad_elems > 0 only for ragged totals
    (total size not reshapable into an (k*sub, mult-of-128) slab)."""
    sub = 8 * max(1, 4 // itemsize)  # packed sublanes: 8 f32, 16 bf16, 32 int8
    # 1) Largest multiple-of-128 column width that divides n (lane-dense vst,
    #    no padding needed).
    cols = next((c for c in (4096, 2048, 1024, 512, 256, 128) if n % c == 0), None)
    if cols is not None:
        rows = n // cols
        if rows % sub == 0:
            return rows, cols, _row_tile(rows, cols, itemsize, sub, target_bytes), 0
        if rows * cols * itemsize <= target_bytes:
            # Small / ragged row count: one full-extent block, still no padding.
            return rows, cols, rows, 0
    # 2) Fallback: zero-pad the flat array up to a (k*sub, cols) slab.
    cols = 512 if n >= 512 * sub else 128
    rows = pl.cdiv(n, sub * cols) * sub
    tr = _row_tile(rows, cols, itemsize, sub, target_bytes)
    return rows, cols, tr, rows * cols - n


@partial(jax.jit, donate_argnums=(0,))
def ptmodule_forward(x):
    """In-place (donating) elementwise forward of PtModule."""
    orig_shape = x.shape
    n = x.size
    rows, cols, tr, pad = _plan(n, x.dtype.itemsize)

    flat = x.reshape(-1)
    if pad:
        # Padding values are irrelevant: the op is elementwise and the padded
        # tail is sliced off below.
        flat = jnp.pad(flat, (0, pad))
    x2 = flat.reshape(rows, cols)

    out = pl.pallas_call(
        _ptmodule_kernel,
        out_shape=jax.ShapeDtypeStruct((rows, cols), x.dtype),
        grid=(rows // tr,),
        in_specs=[pl.BlockSpec((tr, cols), lambda i: (i, 0))],
        out_specs=pl.BlockSpec((tr, cols), lambda i: (i, 0)),
        # In-place HBM update (input is donated by the jit wrapper above).
        input_output_aliases={0: 0},
        compiler_params=pltpu.CompilerParams(
            # Independent row tiles. On single-TC v5e/v6e this is a no-op;
            # on v7x the row axis can additionally be split across the two
            # TensorCores with pltpu.CORE_PARALLEL if profiling shows the
            # grid runs on one core.
            dimension_semantics=("parallel",),
            # 4 live buffers x <=8 MiB tile <= 32 MiB; 48 MiB leaves headroom
            # and fits every generation (v7x physical VMEM is only 64 MiB,
            # v5e's scoped default is only 16 MiB).
            vmem_limit_bytes=48 << 20,
        ),
    )(x2)

    out = out.reshape(-1)
    if pad:
        out = out[:n]
    return out.reshape(orig_shape)


def _reference(x):
    y = ((x + 1.0) * 2.0) / 3.0
    return jnp.where(y > 0.0, y - 5.0, y)


if __name__ == "__main__":
    key = jax.random.PRNGKey(0)
    ok = True
    # 2-D inputs consistent with the module's x[i, j] indexing:
    #  (8, 128)   -> tiny, single full-extent block
    #  (512, 256) -> lane-dense 4096-wide reflow, single big tile
    #  (1024, 512)-> multi-step pipelined grid
    #  (10, 100)  -> ragged total, exercises the pad+slice fallback
    for shape in [(8, 128), (512, 256), (1024, 512), (10, 100)]:
        key, k = jax.random.split(key)
        x = jax.random.normal(k, shape, dtype=jnp.float32)
        y_ref = _reference(x)
        y_ref.block_until_ready()  # finish before the donating kernel call
        out = jax.block_until_ready(ptmodule_forward(x))
        ok &= bool(jnp.allclose(out, y_ref, atol=1e-5, rtol=1e-5))
    assert ok, "mismatch vs reference"
    print("KERNEL_OK")
</pallas_src>

<mosaic_0001>
module attributes {stable_mosaic.version = 11 : i64} {
  func.func @_ptmodule_kernel(%arg0: i32, %arg1: memref<1x1024xf32, #tpu.memory_space<vmem>>, %arg2: memref<1x1024xf32, #tpu.memory_space<vmem>>) attributes {dimension_semantics = [#tpu.dimension_semantics<parallel>], iteration_bounds = array<i64: 1>, scalar_prefetch = 0 : i64, scratch_operands = 0 : i64, tpu.core_type = #tpu.core_type<tc>, window_params = [{transform_indices = @transform_0, window_bounds = array<i64: 1, 1024>}, {transform_indices = @transform_1, window_bounds = array<i64: 1, 1024>}]} {
    %c0 = arith.constant 0 : index
    %c0_0 = arith.constant 0 : index
    %0 = vector.load %arg1[%c0, %c0_0] : memref<1x1024xf32, #tpu.memory_space<vmem>>, vector<1x1024xf32>
    %cst = arith.constant 1.000000e+00 : f32
    %1 = vector.broadcast %cst : f32 to vector<1x1024xf32>
    %2 = arith.addf %0, %1 : vector<1x1024xf32>
    %cst_1 = arith.constant 2.000000e+00 : f32
    %3 = vector.broadcast %cst_1 : f32 to vector<1x1024xf32>
    %4 = arith.mulf %2, %3 : vector<1x1024xf32>
    %cst_2 = arith.constant 3.000000e+00 : f32
    %5 = vector.broadcast %cst_2 : f32 to vector<1x1024xf32>
    %6 = arith.divf %4, %5 : vector<1x1024xf32>
    %cst_3 = arith.constant 0.000000e+00 : f32
    %7 = vector.broadcast %cst_3 : f32 to vector<1x1024xf32>
    %8 = arith.cmpf ogt, %6, %7 : vector<1x1024xf32>
    %cst_4 = arith.constant 5.000000e+00 : f32
    %9 = vector.broadcast %cst_4 : f32 to vector<1x1024xf32>
    %10 = arith.subf %6, %9 : vector<1x1024xf32>
    %11 = arith.select %8, %10, %6 : vector<1x1024xi1>, vector<1x1024xf32>
    %c0_5 = arith.constant 0 : index
    %c0_6 = arith.constant 0 : index
    %12 = vector.load %arg2[%c0_5, %c0_6] : memref<1x1024xf32, #tpu.memory_space<vmem>>, vector<1x1024xf32>
    tpu.vector_store %arg2[%c0_5, %c0_6], %11 {strides = array<i32>} : memref<1x1024xf32, #tpu.memory_space<vmem>>, vector<1x1024xf32>,
    return
  }
  func.func @transform_0(%arg0: i32) -> (i32, i32) {
    %c0_i32 = arith.constant 0 : i32
    %c0_i32_0 = arith.constant 0 : i32
    return %arg0, %c0_i32 : i32, i32
  }
  func.func @transform_1(%arg0: i32) -> (i32, i32) {
    %c0_i32 = arith.constant 0 : i32
    %c0_i32_0 = arith.constant 0 : i32
    return %arg0, %c0_i32 : i32, i32
  }
}

</mosaic_0001>

<bundles_post_ra>
// kernel: ptmodule_forward.1
= control target key start
LH: loop header
LB: loop body
LE: loop exit
PB: predicated region body
PF: predicated region fallthrough
CT: control target
= control target key end

     0   :  { %6 = vsyncpa [#allocation3], 0  ;;  %s110_s0 = inlined_call_operand.hbm [shape: f32[1,1024], index: 0, kind: input, shape index: {}, may-alias: {0,1}]   ;;  %s111_s1 = inlined_call_operand.hbm [shape: f32[1,1024], index: 1, kind: output, shape index: {}, may-alias: {0,1}]  }
   0x1   :  { %7 = vsyncpa [#allocation4], 0  ;;  %s92_s6 = smov [#allocation2]  }
   0x2   :  { %s14_s7 = sshll.u32 %s92_s6, 4  ;;  %s15_s7 = int_to_ptr.vmem [resolvable:$true] %s14_s7 }
   0x3   :  { %s56_s8 = scalar_lea.vmem %s15_s7, 128  ;;  %p61_p1 = scmp.lt.s32.totalorder %s15_s7, %s15_s7 }
   0x4   :  { %p57_p0 = scmp.ne.s32.totalorder %s15_s7, %s56_s8  ;;  %p62_p2 = scmp.lt.s32.totalorder %s56_s8, %s56_s8 }
   0x6   :  { %p63_p3 = por %p62_p2, %p61_p1 }
   0x8   :  { %p64_p4 = pnand %p63_p3, %p57_p0 }
   0xa   :  { %67 = shalt.err (!%p64_p4)
}
   0xb   :  { %17 = dma.hbm_to_vmem [thread:$0]  %s110_s0, 128, %s15_s7, [#allocation3]  }
   0xc   :  { %88 = dma.done.wait [#allocation3], 128  }
   0xd   :  { %89 = vsyncadd [#allocation3], 4294967168  ;;  %v21_v0 = vld [vmem:[#allocation2] sm:$0xff]  ;;  %s93_s11 = smov [#allocation5]  }
   0xe   :  { %v22_v1 = vadd.f32 1.0, %v21_v0  ;;  %s36_s12 = sshll.u32 %s93_s11, 4  ;;  %s37_s12 = int_to_ptr.vmem [resolvable:$true] %s36_s12 }
   0xf   :  { %s68_s13 = scalar_lea.vmem %s37_s12, 128  ;;  %p73_p6 = scmp.lt.s32.totalorder %s37_s12, %s37_s12 }
  0x10   :  { %v23_v2 = vmul.f32 2.0, %v22_v1  ;;  %p69_p5 = scmp.ne.s32.totalorder %s37_s12, %s68_s13  ;;  %p74_p7 = scmp.lt.s32.totalorder %s68_s13, %s68_s13 }
  0x12   :  { %v25_v3 = vmul.f32 0.33333334, %v23_v2  ;;  %p75_p8 = por %p74_p7, %p73_p6 }
  0x14   :  { %vm26_vm0 = vcmp.gt.f32.partialorder %v25_v3, 0.0  ;;  %v45_v4 = vadd.f32 -5.0, %v25_v3  ;;  %p76_p9 = pnand %p75_p8, %p69_p5 }
  0x16   :  { %v28_v5 = vsel %vm26_vm0, %v45_v4, %v25_v3 }
  0x17   :  { %29 = vst [vmem:[#allocation5] sm:$0xff] %v28_v5 }
  0x18   :  { %79 = shalt.err (!%p76_p9)
}
  0x19   :  { %39 = dma.vmem_to_hbm [thread:$0]  %s37_s12, 128, %s111_s1, [#allocation4]  }
  0x1a   :  { %90 = dma.done.wait [#allocation4], 128  }
  0x1b   :  { %91 = vsyncadd [#allocation4], 4294967168 }
  0x1c   :  { %43 = vsyncpa [#allocation3], 1 }
  0x1d   :  { %44 = vsyncpa [#allocation4], 1 }

</bundles_post_ra>
